<compile_context>
chip_gen: v7x
topology: tpu7x:2x2x1
jax: 0.10.0
libtpu: 0.0.40
codegen_flags: <defaults>
</compile_context>

<pallas_src>
import functools

import jax
import jax.numpy as jnp
from jax.experimental import pallas as pl
from jax.experimental.pallas import tpu as pltpu

_LANE = 128
_SUBLANE = 8


def _round_up(x, m):
    return ((x + m - 1) // m) * m


def _autoencoder_kernel(
    x_ref,
    w_e1, b_e1, w_e2, b_e2, w_e3, b_e3,
    w_d1, b_d1, w_d2, b_d2, w_d3, b_d3,
    enc_ref, dec_ref,
):
    """Fused 6-layer autoencoder forward on one (tile_b, D_pad) batch tile.

    Weights are VMEM-resident and already cast to the matmul compute dtype
    (bf16 or f32); biases are f32.  Every matmul accumulates in f32 on the MXU;
    bias add / ReLU run on the VPU and sigmoid on the EUP, all in f32.
    """
    cdt = w_e1.dtype  # matmul operand dtype (bf16 by default)

    def dense(h_f32, w_ref, b_ref, act):
        h = h_f32 if h_f32.dtype == cdt else h_f32.astype(cdt)
        y = jnp.dot(h, w_ref[...], preferred_element_type=jnp.float32) + b_ref[...]
        if act == "relu":
            y = jnp.maximum(y, 0.0)
        elif act == "sigmoid":
            y = jax.nn.sigmoid(y)
        return y

    x = x_ref[...]

    # ---------- encoder ----------
    h = dense(x, w_e1, b_e1, "relu")
    h = dense(h, w_e2, b_e2, "relu")
    enc = dense(h, w_e3, b_e3, None)

    # ---------- decoder ----------
    d = dense(enc, w_d1, b_d1, "relu")
    d = dense(d, w_d2, b_d2, "relu")
    dec = dense(d, w_d3, b_d3, "sigmoid")

    enc_ref[...] = enc.astype(enc_ref.dtype)
    dec_ref[...] = dec.astype(dec_ref.dtype)


@functools.partial(jax.jit, static_argnames=("tile_b", "compute_dtype"))
def autoencoder_forward(x, params, *, tile_b=256, compute_dtype=jnp.bfloat16):
    """params: dict of weights transposed to (in, out) and biases shaped (1, out).

    Returns (encoding, reconstruction) with the logical (unpadded) shapes.
    """
    B, input_dim = x.shape
    hidden1 = params["w_e1"].shape[1]
    hidden2 = params["w_e2"].shape[1]
    emb = params["w_e3"].shape[1]

    # Lane-pad every feature dim to a multiple of 128 so all matmul N dims are
    # full and enc/dec writebacks are unmasked (lane-dense) stores. Zero padding
    # keeps the math identical once we slice the logical outputs back out.
    Dp = _round_up(input_dim, _LANE)
    H1p = _round_up(hidden1, _LANE)
    H2p = _round_up(hidden2, _LANE)
    Ep = _round_up(emb, _LANE)

    # Batch tile: large enough to fill the MXU M dim, but keep >= 2 grid steps
    # so both TensorCores on v7x get work (no-op on v5e/v6e).
    if B <= tile_b:
        tb = _round_up(max(-(-B // 2), _SUBLANE), _SUBLANE)
    else:
        tb = tile_b
    Bp = _round_up(B, tb)
    grid = (Bp // tb,)

    xp = jnp.pad(x, ((0, Bp - B), (0, Dp - input_dim)))

    def prep_w(name, inp, outp):
        w = params[f"w_{name}"]
        w = jnp.pad(w, ((0, inp - w.shape[0]), (0, outp - w.shape[1])))
        return w.astype(compute_dtype)

    def prep_b(name, outp):
        b = params[f"b_{name}"]
        return jnp.pad(b, ((0, 0), (0, outp - b.shape[1]))).astype(jnp.float32)

    layer_dims = [
        ("e1", Dp, H1p), ("e2", H1p, H2p), ("e3", H2p, Ep),
        ("d1", Ep, H2p), ("d2", H2p, H1p), ("d3", H1p, Dp),
    ]
    weight_args = []
    for name, inp, outp in layer_dims:
        weight_args.append(prep_w(name, inp, outp))
        weight_args.append(prep_b(name, outp))

    # Whole-array VMEM residency for weights/biases: allocated once for the whole
    # grid, removed from the per-step DMA/double-buffer schedule.
    vmem_resident = pl.BlockSpec(memory_space=pltpu.MemorySpace.VMEM)
    in_specs = [pl.BlockSpec((tb, Dp), lambda i: (i, 0))]
    in_specs += [vmem_resident] * len(weight_args)

    out_specs = (
        pl.BlockSpec((tb, Ep), lambda i: (i, 0)),
        pl.BlockSpec((tb, Dp), lambda i: (i, 0)),
    )
    out_shape = (
        jax.ShapeDtypeStruct((Bp, Ep), x.dtype),
        jax.ShapeDtypeStruct((Bp, Dp), x.dtype),
    )

    # Explicit VMEM budget: weights (single-buffered) + double-buffered batch
    # tiles + live intermediates. Only raise the scoped limit if actually needed,
    # and stay well under v7x's 64 MiB physical VMEM.
    weight_bytes = sum(w.size * w.dtype.itemsize for w in weight_args)
    io_tile_bytes = 2 * tb * (Dp + Ep + Dp) * 4      # double-buffered x/enc/dec tiles
    tmp_bytes = 2 * tb * (H1p + H2p) * 4             # f32 intermediates
    needed = weight_bytes + io_tile_bytes + tmp_bytes
    compiler_kwargs = dict(dimension_semantics=("parallel",))
    if needed * 2 > (16 << 20):
        compiler_kwargs["vmem_limit_bytes"] = int(min(needed * 2, 48 << 20))

    enc_p, dec_p = pl.pallas_call(
        _autoencoder_kernel,
        grid_spec=pltpu.PrefetchScalarGridSpec(
            num_scalar_prefetch=0,
            grid=grid,
            in_specs=in_specs,
            out_specs=out_specs,
        ),
        out_shape=out_shape,
        compiler_params=pltpu.CompilerParams(**compiler_kwargs),
    )(xp, *weight_args)

    # Slice the logical (unpadded) outputs back out.
    return enc_p[:B, :emb], dec_p[:B, :input_dim]


def init_params(key, input_dim, hidden1, hidden2, emb, dtype=jnp.float32):
    """Deterministic init mimicking nn.Linear's U(-1/sqrt(fan_in), 1/sqrt(fan_in)).
    Weights are returned already transposed to (in, out); biases as (1, out)."""
    dims = [
        ("e1", input_dim, hidden1),
        ("e2", hidden1, hidden2),
        ("e3", hidden2, emb),
        ("d1", emb, hidden2),
        ("d2", hidden2, hidden1),
        ("d3", hidden1, input_dim),
    ]
    params = {}
    for name, fan_in, fan_out in dims:
        key, kw, kb = jax.random.split(key, 3)
        bound = 1.0 / jnp.sqrt(fan_in)
        params[f"w_{name}"] = jax.random.uniform(
            kw, (fan_in, fan_out), dtype, minval=-bound, maxval=bound)
        params[f"b_{name}"] = jax.random.uniform(
            kb, (1, fan_out), dtype, minval=-bound, maxval=bound)
    return params


def reference_forward(x, params):
    """Pure-JAX reference (same math as the PyTorch module)."""
    h = jax.nn.relu(x @ params["w_e1"] + params["b_e1"])
    h = jax.nn.relu(h @ params["w_e2"] + params["b_e2"])
    enc = h @ params["w_e3"] + params["b_e3"]
    d = jax.nn.relu(enc @ params["w_d1"] + params["b_d1"])
    d = jax.nn.relu(d @ params["w_d2"] + params["b_d2"])
    dec = jax.nn.sigmoid(d @ params["w_d3"] + params["b_d3"])
    return enc, dec


if __name__ == "__main__":
    # Small shapes consistent with the module's forward (batch, input_dim).
    batch, input_dim, hidden1, hidden2, emb = 16, 64, 32, 16, 8

    key = jax.random.PRNGKey(0)
    key, kx = jax.random.split(key)
    x = jax.random.uniform(kx, (batch, input_dim), jnp.float32)
    params = init_params(key, input_dim, hidden1, hidden2, emb)

    enc_ref, dec_ref = reference_forward(x, params)

    # 1) f32 matmul path: must match the pure-JAX reference tightly.
    enc32, dec32 = autoencoder_forward(x, params, compute_dtype=jnp.float32)
    enc32, dec32 = jax.block_until_ready((enc32, dec32))
    assert enc32.shape == (batch, emb) and dec32.shape == (batch, input_dim)
    assert jnp.allclose(enc32, enc_ref, atol=1e-5, rtol=1e-5)
    assert jnp.allclose(dec32, dec_ref, atol=1e-5, rtol=1e-5)

    # 2) Default bf16-operand path (MXU-friendly): looser tolerance vs f32 ref.
    enc16, dec16 = autoencoder_forward(x, params)
    enc16, dec16 = jax.block_until_ready((enc16, dec16))
    assert enc16.shape == (batch, emb) and dec16.shape == (batch, input_dim)
    assert jnp.allclose(enc16, enc_ref, atol=5e-2, rtol=5e-2)
    assert jnp.allclose(dec16, dec_ref, atol=5e-2, rtol=5e-2)

    print("KERNEL_OK")
</pallas_src>

<mosaic_0001>
module attributes {stable_mosaic.version = 11 : i64} {
  func.func @_autoencoder_kernel(%arg0: i32, %arg1: memref<8x128xf32, #tpu.memory_space<vmem>>, %arg2: memref<128x128xf32, #tpu.memory_space<vmem>>, %arg3: memref<1x128xf32, #tpu.memory_space<vmem>>, %arg4: memref<128x128xf32, #tpu.memory_space<vmem>>, %arg5: memref<1x128xf32, #tpu.memory_space<vmem>>, %arg6: memref<128x128xf32, #tpu.memory_space<vmem>>, %arg7: memref<1x128xf32, #tpu.memory_space<vmem>>, %arg8: memref<128x128xf32, #tpu.memory_space<vmem>>, %arg9: memref<1x128xf32, #tpu.memory_space<vmem>>, %arg10: memref<128x128xf32, #tpu.memory_space<vmem>>, %arg11: memref<1x128xf32, #tpu.memory_space<vmem>>, %arg12: memref<128x128xf32, #tpu.memory_space<vmem>>, %arg13: memref<1x128xf32, #tpu.memory_space<vmem>>, %arg14: memref<8x128xf32, #tpu.memory_space<vmem>>, %arg15: memref<8x128xf32, #tpu.memory_space<vmem>>) attributes {dimension_semantics = [#tpu.dimension_semantics<parallel>], iteration_bounds = array<i64: 2>, scalar_prefetch = 0 : i64, scratch_operands = 0 : i64, tpu.core_type = #tpu.core_type<tc>, window_params = [{transform_indices = @transform_0, window_bounds = array<i64: 8, 128>}, {pipeline_mode = #tpu.pipeline_mode<synchronous>, transform_indices = @transform_1, window_bounds = array<i64: 128, 128>}, {pipeline_mode = #tpu.pipeline_mode<synchronous>, transform_indices = @transform_2, window_bounds = array<i64: 1, 128>}, {pipeline_mode = #tpu.pipeline_mode<synchronous>, transform_indices = @transform_3, window_bounds = array<i64: 128, 128>}, {pipeline_mode = #tpu.pipeline_mode<synchronous>, transform_indices = @transform_4, window_bounds = array<i64: 1, 128>}, {pipeline_mode = #tpu.pipeline_mode<synchronous>, transform_indices = @transform_5, window_bounds = array<i64: 128, 128>}, {pipeline_mode = #tpu.pipeline_mode<synchronous>, transform_indices = @transform_6, window_bounds = array<i64: 1, 128>}, {pipeline_mode = #tpu.pipeline_mode<synchronous>, transform_indices = @transform_7, window_bounds = array<i64: 128, 128>}, {pipeline_mode = #tpu.pipeline_mode<synchronous>, transform_indices = @transform_8, window_bounds = array<i64: 1, 128>}, {pipeline_mode = #tpu.pipeline_mode<synchronous>, transform_indices = @transform_9, window_bounds = array<i64: 128, 128>}, {pipeline_mode = #tpu.pipeline_mode<synchronous>, transform_indices = @transform_10, window_bounds = array<i64: 1, 128>}, {pipeline_mode = #tpu.pipeline_mode<synchronous>, transform_indices = @transform_11, window_bounds = array<i64: 128, 128>}, {pipeline_mode = #tpu.pipeline_mode<synchronous>, transform_indices = @transform_12, window_bounds = array<i64: 1, 128>}, {transform_indices = @transform_13, window_bounds = array<i64: 8, 128>}, {transform_indices = @transform_14, window_bounds = array<i64: 8, 128>}]} {
    %c0 = arith.constant 0 : index
    %c0_0 = arith.constant 0 : index
    %0 = vector.load %arg1[%c0, %c0_0] : memref<8x128xf32, #tpu.memory_space<vmem>>, vector<8x128xf32>
    %c0_1 = arith.constant 0 : index
    %c0_2 = arith.constant 0 : index
    %1 = vector.load %arg2[%c0_1, %c0_2] : memref<128x128xf32, #tpu.memory_space<vmem>>, vector<128x128xf32>
    %cst = arith.constant dense<0.000000e+00> : vector<8x128xf32>
    %2 = tpu.matmul %0, %1, %cst {dimension_numbers = #tpu.dot_dimension_numbers<[1], [0], [0], [1], [0, 0, 1, 1], [], []>} : vector<8x128xf32>, vector<128x128xf32>, vector<8x128xf32> -> vector<8x128xf32>
    %c0_3 = arith.constant 0 : index
    %c0_4 = arith.constant 0 : index
    %3 = vector.load %arg3[%c0_3, %c0_4] : memref<1x128xf32, #tpu.memory_space<vmem>>, vector<1x128xf32>
    %4 = vector.broadcast %3 : vector<1x128xf32> to vector<8x128xf32>
    %5 = arith.addf %2, %4 : vector<8x128xf32>
    %cst_5 = arith.constant 0.000000e+00 : f32
    %6 = vector.broadcast %cst_5 : f32 to vector<8x128xf32>
    %7 = arith.maximumf %5, %6 : vector<8x128xf32>
    %c0_6 = arith.constant 0 : index
    %c0_7 = arith.constant 0 : index
    %8 = vector.load %arg4[%c0_6, %c0_7] : memref<128x128xf32, #tpu.memory_space<vmem>>, vector<128x128xf32>
    %cst_8 = arith.constant dense<0.000000e+00> : vector<8x128xf32>
    %9 = tpu.matmul %7, %8, %cst_8 {dimension_numbers = #tpu.dot_dimension_numbers<[1], [0], [0], [1], [0, 0, 1, 1], [], []>} : vector<8x128xf32>, vector<128x128xf32>, vector<8x128xf32> -> vector<8x128xf32>
    %c0_9 = arith.constant 0 : index
    %c0_10 = arith.constant 0 : index
    %10 = vector.load %arg5[%c0_9, %c0_10] : memref<1x128xf32, #tpu.memory_space<vmem>>, vector<1x128xf32>
    %11 = vector.broadcast %10 : vector<1x128xf32> to vector<8x128xf32>
    %12 = arith.addf %9, %11 : vector<8x128xf32>
    %cst_11 = arith.constant 0.000000e+00 : f32
    %13 = vector.broadcast %cst_11 : f32 to vector<8x128xf32>
    %14 = arith.maximumf %12, %13 : vector<8x128xf32>
    %c0_12 = arith.constant 0 : index
    %c0_13 = arith.constant 0 : index
    %15 = vector.load %arg6[%c0_12, %c0_13] : memref<128x128xf32, #tpu.memory_space<vmem>>, vector<128x128xf32>
    %cst_14 = arith.constant dense<0.000000e+00> : vector<8x128xf32>
    %16 = tpu.matmul %14, %15, %cst_14 {dimension_numbers = #tpu.dot_dimension_numbers<[1], [0], [0], [1], [0, 0, 1, 1], [], []>} : vector<8x128xf32>, vector<128x128xf32>, vector<8x128xf32> -> vector<8x128xf32>
    %c0_15 = arith.constant 0 : index
    %c0_16 = arith.constant 0 : index
    %17 = vector.load %arg7[%c0_15, %c0_16] : memref<1x128xf32, #tpu.memory_space<vmem>>, vector<1x128xf32>
    %18 = vector.broadcast %17 : vector<1x128xf32> to vector<8x128xf32>
    %19 = arith.addf %16, %18 : vector<8x128xf32>
    %c0_17 = arith.constant 0 : index
    %c0_18 = arith.constant 0 : index
    %20 = vector.load %arg8[%c0_17, %c0_18] : memref<128x128xf32, #tpu.memory_space<vmem>>, vector<128x128xf32>
    %cst_19 = arith.constant dense<0.000000e+00> : vector<8x128xf32>
    %21 = tpu.matmul %19, %20, %cst_19 {dimension_numbers = #tpu.dot_dimension_numbers<[1], [0], [0], [1], [0, 0, 1, 1], [], []>} : vector<8x128xf32>, vector<128x128xf32>, vector<8x128xf32> -> vector<8x128xf32>
    %c0_20 = arith.constant 0 : index
    %c0_21 = arith.constant 0 : index
    %22 = vector.load %arg9[%c0_20, %c0_21] : memref<1x128xf32, #tpu.memory_space<vmem>>, vector<1x128xf32>
    %23 = vector.broadcast %22 : vector<1x128xf32> to vector<8x128xf32>
    %24 = arith.addf %21, %23 : vector<8x128xf32>
    %cst_22 = arith.constant 0.000000e+00 : f32
    %25 = vector.broadcast %cst_22 : f32 to vector<8x128xf32>
    %26 = arith.maximumf %24, %25 : vector<8x128xf32>
    %c0_23 = arith.constant 0 : index
    %c0_24 = arith.constant 0 : index
    %27 = vector.load %arg10[%c0_23, %c0_24] : memref<128x128xf32, #tpu.memory_space<vmem>>, vector<128x128xf32>
    %cst_25 = arith.constant dense<0.000000e+00> : vector<8x128xf32>
    %28 = tpu.matmul %26, %27, %cst_25 {dimension_numbers = #tpu.dot_dimension_numbers<[1], [0], [0], [1], [0, 0, 1, 1], [], []>} : vector<8x128xf32>, vector<128x128xf32>, vector<8x128xf32> -> vector<8x128xf32>
    %c0_26 = arith.constant 0 : index
    %c0_27 = arith.constant 0 : index
    %29 = vector.load %arg11[%c0_26, %c0_27] : memref<1x128xf32, #tpu.memory_space<vmem>>, vector<1x128xf32>
    %30 = vector.broadcast %29 : vector<1x128xf32> to vector<8x128xf32>
    %31 = arith.addf %28, %30 : vector<8x128xf32>
    %cst_28 = arith.constant 0.000000e+00 : f32
    %32 = vector.broadcast %cst_28 : f32 to vector<8x128xf32>
    %33 = arith.maximumf %31, %32 : vector<8x128xf32>
    %c0_29 = arith.constant 0 : index
    %c0_30 = arith.constant 0 : index
    %34 = vector.load %arg12[%c0_29, %c0_30] : memref<128x128xf32, #tpu.memory_space<vmem>>, vector<128x128xf32>
    %cst_31 = arith.constant dense<0.000000e+00> : vector<8x128xf32>
    %35 = tpu.matmul %33, %34, %cst_31 {dimension_numbers = #tpu.dot_dimension_numbers<[1], [0], [0], [1], [0, 0, 1, 1], [], []>} : vector<8x128xf32>, vector<128x128xf32>, vector<8x128xf32> -> vector<8x128xf32>
    %c0_32 = arith.constant 0 : index
    %c0_33 = arith.constant 0 : index
    %36 = vector.load %arg13[%c0_32, %c0_33] : memref<1x128xf32, #tpu.memory_space<vmem>>, vector<1x128xf32>
    %37 = vector.broadcast %36 : vector<1x128xf32> to vector<8x128xf32>
    %38 = arith.addf %35, %37 : vector<8x128xf32>
    %39 = arith.negf %38 : vector<8x128xf32>
    %40 = math.exp %39 : vector<8x128xf32>
    %cst_34 = arith.constant 1.000000e+00 : f32
    %41 = vector.broadcast %cst_34 : f32 to vector<8x128xf32>
    %42 = arith.addf %41, %40 : vector<8x128xf32>
    %43 = arith.divf %41, %42 : vector<8x128xf32>
    %c0_35 = arith.constant 0 : index
    %c0_36 = arith.constant 0 : index
    %44 = vector.load %arg14[%c0_35, %c0_36] : memref<8x128xf32, #tpu.memory_space<vmem>>, vector<8x128xf32>
    tpu.vector_store %arg14[%c0_35, %c0_36], %19 {strides = array<i32>} : memref<8x128xf32, #tpu.memory_space<vmem>>, vector<8x128xf32>,
    %c0_37 = arith.constant 0 : index
    %c0_38 = arith.constant 0 : index
    %45 = vector.load %arg15[%c0_37, %c0_38] : memref<8x128xf32, #tpu.memory_space<vmem>>, vector<8x128xf32>
    tpu.vector_store %arg15[%c0_37, %c0_38], %43 {strides = array<i32>} : memref<8x128xf32, #tpu.memory_space<vmem>>, vector<8x128xf32>,
    return
  }
  func.func @transform_0(%arg0: i32) -> (i32, i32) {
    %c0_i32 = arith.constant 0 : i32
    %c0_i32_0 = arith.constant 0 : i32
    return %arg0, %c0_i32 : i32, i32
  }
  func.func @transform_1(%arg0: i32) -> (i32, i32) {
    %c0_i32 = arith.constant 0 : i32
    %c0_i32_0 = arith.constant 0 : i32
    %c0_i32_1 = arith.constant 0 : i32
    return %c0_i32, %c0_i32_0 : i32, i32
  }
  func.func @transform_2(%arg0: i32) -> (i32, i32) {
    %c0_i32 = arith.constant 0 : i32
    %c0_i32_0 = arith.constant 0 : i32
    %c0_i32_1 = arith.constant 0 : i32
    return %c0_i32, %c0_i32_0 : i32, i32
  }
  func.func @transform_3(%arg0: i32) -> (i32, i32) {
    %c0_i32 = arith.constant 0 : i32
    %c0_i32_0 = arith.constant 0 : i32
    %c0_i32_1 = arith.constant 0 : i32
    return %c0_i32, %c0_i32_0 : i32, i32
  }
  func.func @transform_4(%arg0: i32) -> (i32, i32) {
    %c0_i32 = arith.constant 0 : i32
    %c0_i32_0 = arith.constant 0 : i32
    %c0_i32_1 = arith.constant 0 : i32
    return %c0_i32, %c0_i32_0 : i32, i32
  }
  func.func @transform_5(%arg0: i32) -> (i32, i32) {
    %c0_i32 = arith.constant 0 : i32
    %c0_i32_0 = arith.constant 0 : i32
    %c0_i32_1 = arith.constant 0 : i32
    return %c0_i32, %c0_i32_0 : i32, i32
  }
  func.func @transform_6(%arg0: i32) -> (i32, i32) {
    %c0_i32 = arith.constant 0 : i32
    %c0_i32_0 = arith.constant 0 : i32
    %c0_i32_1 = arith.constant 0 : i32
    return %c0_i32, %c0_i32_0 : i32, i32
  }
  func.func @transform_7(%arg0: i32) -> (i32, i32) {
    %c0_i32 = arith.constant 0 : i32
    %c0_i32_0 = arith.constant 0 : i32
    %c0_i32_1 = arith.constant 0 : i32
    return %c0_i32, %c0_i32_0 : i32, i32
  }
  func.func @transform_8(%arg0: i32) -> (i32, i32) {
    %c0_i32 = arith.constant 0 : i32
    %c0_i32_0 = arith.constant 0 : i32
    %c0_i32_1 = arith.constant 0 : i32
    return %c0_i32, %c0_i32_0 : i32, i32
  }
  func.func @transform_9(%arg0: i32) -> (i32, i32) {
    %c0_i32 = arith.constant 0 : i32
    %c0_i32_0 = arith.constant 0 : i32
    %c0_i32_1 = arith.constant 0 : i32
    return %c0_i32, %c0_i32_0 : i32, i32
  }
  func.func @transform_10(%arg0: i32) -> (i32, i32) {
    %c0_i32 = arith.constant 0 : i32
    %c0_i32_0 = arith.constant 0 : i32
    %c0_i32_1 = arith.constant 0 : i32
    return %c0_i32, %c0_i32_0 : i32, i32
  }
  func.func @transform_11(%arg0: i32) -> (i32, i32) {
    %c0_i32 = arith.constant 0 : i32
    %c0_i32_0 = arith.constant 0 : i32
    %c0_i32_1 = arith.constant 0 : i32
    return %c0_i32, %c0_i32_0 : i32, i32
  }
  func.func @transform_12(%arg0: i32) -> (i32, i32) {
    %c0_i32 = arith.constant 0 : i32
    %c0_i32_0 = arith.constant 0 : i32
    %c0_i32_1 = arith.constant 0 : i32
    return %c0_i32, %c0_i32_0 : i32, i32
  }
  func.func @transform_13(%arg0: i32) -> (i32, i32) {
    %c0_i32 = arith.constant 0 : i32
    %c0_i32_0 = arith.constant 0 : i32
    return %arg0, %c0_i32 : i32, i32
  }
  func.func @transform_14(%arg0: i32) -> (i32, i32) {
    %c0_i32 = arith.constant 0 : i32
    %c0_i32_0 = arith.constant 0 : i32
    return %arg0, %c0_i32 : i32, i32
  }
}

</mosaic_0001>

<bundles_post_ra>
// kernel: autoencoder_forward.1
= control target key start
LH: loop header
LB: loop body
LE: loop exit
PB: predicated region body
PF: predicated region fallthrough
CT: control target
= control target key end

     0   :  { %20 = vsyncpa [#allocation3], 0  ;;  %s2288_s0 = inlined_call_operand.vmem [shape: f32[16,128], index: 0, kind: input, shape index: {}]   ;;  %s2289_s1 = inlined_call_operand.vmem [shape: f32[128,128], index: 1, kind: input, shape index: {}]   ;;  %s2290_s2 = inlined_call_operand.vmem [shape: f32[1,128], index: 2, kind: input, shape index: {}]   ;;  %s2291_s3 = inlined_call_operand.vmem [shape: f32[128,128], index: 3, kind: input, shape index: {}]   ;;  %s2292_s4 = inlined_call_operand.vmem [shape: f32[1,128], index: 4, kind: input, shape index: {}]   ;;  %s2293_s5 = inlined_call_operand.vmem [shape: f32[128,128], index: 5, kind: input, shape index: {}]   ;;  %s2294_s6 = inlined_call_operand.vmem [shape: f32[1,128], index: 6, kind: input, shape index: {}]   ;;  %s2295_s7 = inlined_call_operand.vmem [shape: f32[128,128], index: 7, kind: input, shape index: {}]   ;;  %s2296_s8 = inlined_call_operand.vmem [shape: f32[1,128], index: 8, kind: input, shape index: {}]   ;;  %s2297_s9 = inlined_call_operand.vmem [shape: f32[128,128], index: 9, kind: input, shape index: {}]   ;;  %s2298_s10 = inlined_call_operand.vmem [shape: f32[1,128], index: 10, kind: input, shape index: {}]   ;;  %s2299_s11 = inlined_call_operand.vmem [shape: f32[128,128], index: 11, kind: input, shape index: {}]   ;;  %s2300_s12 = inlined_call_operand.vmem [shape: f32[1,128], index: 12, kind: input, shape index: {}]   ;;  %s2301_s13 = inlined_call_operand.vmem [shape: f32[16,128], index: 13, kind: output, shape index: {0}]   ;;  %s2302_s14 = inlined_call_operand.hbm [shape: f32[16,128], index: 14, kind: output, shape index: {1}]  }
   0x1   :  { %22 = vsyncpa [#allocation3 + $0x1], 0  ;;  %s1812_s29 = smov 0   ;;  %s1814_s30 = smov 0  }
   0x2   :  { %s1816_s15 = smov 0   ;;  %s1818_s16 = smov 0  }
   0x3 LB: > { %2308 = sst [smem:[#allocation5_spill]] %s1727_s15  ;;  %s1833_s17 = sadd.s32 4294967295, %s1731_s16   ;;  %s1731_s16 = sphi %s1818_s16, %s2316_s16   ;;  %s1727_s15 = sphi %s1816_s15, %s2318_s15   ;;  %s1723_s30 = sphi %s1814_s30, %s2320_s30   ;;  %s1719_s29 = sphi %s1812_s29, %s2319_s29  }
   0x4   : > { %s1149_s18 = sadd.s32 4294967294, %s1731_s16   ;;  %s1837_s19 = sadd.s32 1, %s1731_s16  }
   0x5   : > { %2309 = sst [smem:[#allocation6_spill]] %s1837_s19  ;;  %s339_s20 = sadd.s32 1, %s1727_s15 }
   0x6   : > { %s336_s21 = ssub.s32 %s1731_s16, %s1837_s19  ;;  %p349_p0 = scmp.ne.s32.totalorder %s1727_s15, %s1723_s30 }
   0x7   : > { %p337_p1 = scmp.eq.s32.totalorder %s336_s21, 0  ;;  %p350_p2 = scmp.eq.s32.totalorder %s1833_s17, 1 }
   0x8   : > { %p355_p3 = scmp.ne.s32.totalorder %s1723_s30, %s1719_s29  ;;  %p356_p4 = scmp.eq.s32.totalorder %s1149_s18, 1 }
   0x9   : > { %s1848_s22 = scalar_select %p337_p1, %s1727_s15, %s339_s20  }
   0xa   : > { %p1850_p5 = por %p350_p2, %p349_p0  ;;  %p1854_p6 = por %p356_p4, %p355_p3 }
   0xb   : > { %2310 = sst [smem:[#allocation7_spill]] %s1848_s22  ;;  %p1152_p7 = scmp.ge.s32.totalorder %s1731_s16, 1 }
   0xc   : > { %s2312_s24 = scalar_select %p1854_p6, 1, 0 }
   0xd   : > { %p417_p8 = scmp.lt.s32.totalorder %s1731_s16, 3 }
   0xe   : > { %2313 = sst [smem:[#allocation8_spill]] %s2312_s24 }
   0xf   : > { %p418_p9 = pnand %p1152_p7, %p417_p8 }
  0x10   : > { %v475_v0 = vld [vmem:[%s2289_s1] sm:$0xff] (!%p418_p9)  ;;  %v476_v1 = vld [vmem:[%s2289_s1 + $0x8] sm:$0xff] (!%p418_p9)  ;;  %v477_v2 = vld [vmem:[%s2289_s1 + $0x10] sm:$0xff] (!%p418_p9)  ;;  %v1733_v3 = vmov (!%p418_p9), 0.0|0.0   ;;  %vm1734_vm0 = vmmov (!%p418_p9), 0   ;;  %v1735_v6 = vmov (!%p418_p9), 0.0  }
  0x11   : > { %421 = sbr.rel (%p418_p9) target bundleno = 1382 (0x566), region = 72  ;;  %1479 = vmatprep.subr.bf16.mxu0 (!%p418_p9), %v1733_v3  ;;  %v1480_v4 = vpack.c.bf16 (!%p418_p9), %v476_v1, %v475_v0  ;;  %v478_v5 = vld [vmem:[%s2289_s1 + $0x18] sm:$0xff] (!%p418_p9)  ;;  %1301 = vmatprep.mubr.msk.f32.mxu0 (!%p418_p9), %vm1734_vm0, %v1735_v6  ;;  %v479_v8 = vld [vmem:[%s2289_s1 + $0x20] sm:$0xff] (!%p418_p9)  ;;  %v480_v9 = vld [vmem:[%s2289_s1 + $0x28] sm:$0xff] (!%p418_p9)  ;;  %p466_p10 = scmp.lt.s32.totalorder (!%p418_p9), %s1833_s17, 1 }
  0x12   : > { %1503 = vmatprep.subr.bf16.mxu1 (!%p418_p9), %v1733_v3  ;;  %1336 = vmatprep.mubr.msk.f32.mxu1 (!%p418_p9), %vm1734_vm0, %v1735_v6  ;;  %v1483_v7 = vpack.c.bf16 (!%p418_p9), %v478_v5, %v477_v2  ;;  %v569_v10 = vld [vmem:[%s2291_s3] sm:$0xff] (!%p418_p9)  ;;  %v570_v11 = vld [vmem:[%s2291_s3 + $0x8] sm:$0xff] (!%p418_p9)  ;;  %v571_v13 = vld [vmem:[%s2291_s3 + $0x10] sm:$0xff] (!%p418_p9)  ;;  %v1486_v15 = vpack.c.bf16 (!%p418_p9), %v480_v9, %v479_v8  ;;  %s463_s20 = sand.u32 (!%p418_p9), 1, %s1723_s30  }
  0x13   : > { %1481 = vmatpush3.bf16.msra.mxu0 (!%p418_p9), %v1480_v4  ;;  %v1504_v12 = vpack.c.bf16 (!%p418_p9), %v570_v11, %v569_v10  ;;  %v572_v14 = vld [vmem:[%s2291_s3 + $0x18] sm:$0xff] (!%p418_p9)  ;;  %v481_v16 = vld [vmem:[%s2289_s1 + $0x30] sm:$0xff] (!%p418_p9)  ;;  %v573_v19 = vld [vmem:[%s2291_s3 + $0x20] sm:$0xff] (!%p418_p9)  ;;  %s1050_s28 = scalar_lea.sflag (!%p418_p9), [#allocation3], %s463_s20 }
  0x14   : > { %1482 = vmatprep.subr.bf16.mxu0 (!%p418_p9), %v1733_v3  ;;  %v482_v17 = vld [vmem:[%s2289_s1 + $0x38] sm:$0xff] (!%p418_p9)  ;;  %v1507_v18 = vpack.c.bf16 (!%p418_p9), %v572_v14, %v571_v13  ;;  %v574_v20 = vld [vmem:[%s2291_s3 + $0x28] sm:$0xff] (!%p418_p9)  ;;  %v483_v22 = vld [vmem:[%s2289_s1 + $0x40] sm:$0xff] (!%p418_p9) }
  0x15   : > { %1505 = vmatpush3.bf16.msra.mxu1 (!%p418_p9), %v1504_v12  ;;  %v1489_v21 = vpack.c.bf16 (!%p418_p9), %v482_v17, %v481_v16  ;;  %v484_v23 = vld [vmem:[%s2289_s1 + $0x48] sm:$0xff] (!%p418_p9)  ;;  %v1510_v24 = vpack.c.bf16 (!%p418_p9), %v574_v20, %v573_v19  ;;  %v575_v25 = vld [vmem:[%s2291_s3 + $0x30] sm:$0xff] (!%p418_p9)  ;;  %v576_v26 = vld [vmem:[%s2291_s3 + $0x38] sm:$0xff] (!%p418_p9) }
  0x16   : > { %1506 = vmatprep.subr.bf16.mxu1 (!%p418_p9), %v1733_v3  ;;  %v1492_v27 = vpack.c.bf16 (!%p418_p9), %v484_v23, %v483_v22  ;;  %v485_v28 = vld [vmem:[%s2289_s1 + $0x50] sm:$0xff] (!%p418_p9)  ;;  %v486_v29 = vld [vmem:[%s2289_s1 + $0x58] sm:$0xff] (!%p418_p9)  ;;  %v1513_v30 = vpack.c.bf16 (!%p418_p9), %v576_v26, %v575_v25  ;;  %v577_v31 = vld [vmem:[%s2291_s3 + $0x40] sm:$0xff] (!%p418_p9) }
  0x17   : > { %1484 = vmatpush3.bf16.msra.mxu0 (!%p418_p9), %v1483_v7  ;;  %v578_v32 = vld [vmem:[%s2291_s3 + $0x48] sm:$0xff] (!%p418_p9)  ;;  %v1495_v33 = vpack.c.bf16 (!%p418_p9), %v486_v29, %v485_v28  ;;  %v487_v34 = vld [vmem:[%s2289_s1 + $0x60] sm:$0xff] (!%p418_p9)  ;;  %v579_v37 = vld [vmem:[%s2291_s3 + $0x50] sm:$0xff] (!%p418_p9) }
  0x18   : > { %1485 = vmatprep.subr.bf16.mxu0 %v1733_v3  ;;  %v488_v35 = vld [vmem:[%s2289_s1 + $0x68] sm:$0xff]  ;;  %v1516_v36 = vpack.c.bf16 %v578_v32, %v577_v31  ;;  %s1948_s24 = scalar_select %p466_p10, %s1833_s17, 1  ;;  %v580_v38 = vld [vmem:[%s2291_s3 + $0x58] sm:$0xff]  ;;  %v489_v40 = vld [vmem:[%s2289_s1 + $0x70] sm:$0xff] }
  0x19   : > { %1508 = vmatpush3.bf16.msra.mxu1 %v1507_v18  ;;  %v1498_v39 = vpack.c.bf16 %v488_v35, %v487_v34  ;;  %v490_v41 = vld [vmem:[%s2289_s1 + $0x78] sm:$0xff]  ;;  %v1519_v42 = vpack.c.bf16 %v580_v38, %v579_v37  ;;  %v581_v43 = vld [vmem:[%s2291_s3 + $0x60] sm:$0xff]  ;;  %v582_v44 = vld [vmem:[%s2291_s3 + $0x68] sm:$0xff] }
  0x1a   : > { %1509 = vmatprep.subr.bf16.mxu1 %v1733_v3  ;;  %s2307_s15 = sshll.u32 %s1948_s24, 3  ;;  %v1501_v45 = vpack.c.bf16 %v490_v41, %v489_v40  ;;  %v1522_v46 = vpack.c.bf16 %v582_v44, %v581_v43  ;;  %v583_v48 = vld [vmem:[%s2291_s3 + $0x70] sm:$0xff]  ;;  %v584_v49 = vld [vmem:[%s2291_s3 + $0x78] sm:$0xff]  ;;  %v663_v51 = vld [vmem:[%s2293_s5] sm:$0xff]  ;;  %s2314_s19 = sshll.u32 %s1948_s24, 3 }
  0x1b   : > { %1487 = vmatpush3.bf16.msra.mxu0 %v1486_v15  ;;  %s469_s22 = scalar_lea.vmem %s2288_s0, %s2307_s15  ;;  %v1525_v50 = vpack.c.bf16 %v584_v49, %v583_v48  ;;  %v664_v52 = vld [vmem:[%s2293_s5 + $0x8] sm:$0xff]  ;;  %v665_v53 = vld [vmem:[%s2293_s5 + $0x10] sm:$0xff]  ;;  %v666_v55 = vld [vmem:[%s2293_s5 + $0x18] sm:$0xff]  ;;  %s473_s21 = scalar_lea.vmem %s2301_s13, %s2314_s19 }
  0x1c   : > { %1488 = vmatprep.subr.bf16.mxu0 %v1733_v3  ;;  %v474_v47 = vld [vmem:[%s469_s22] sm:$0xff]  ;;  %v1528_v54 = vpack.c.bf16 %v664_v52, %v663_v51  ;;  %v1531_v56 = vpack.c.bf16 %v666_v55, %v665_v53  ;;  %v668_v58 = vld [vmem:[%s2293_s5 + $0x28] sm:$0xff]  ;;  %v669_v60 = vld [vmem:[%s2293_s5 + $0x30] sm:$0xff]  ;;  %s1164_s15 = sshll.u32 %s1833_s17, 7  ;;  %s1736_s17 = smov [#allocation2]  }
  0x1d   : > { %1511 = vmatpush3.bf16.msra.mxu1 %v1510_v24  ;;  %v667_v57 = vld [vmem:[%s2293_s5 + $0x20] sm:$0xff]  ;;  %v670_v61 = vld [vmem:[%s2293_s5 + $0x38] sm:$0xff]  ;;  %v672_v0 = vld [vmem:[%s2293_s5 + $0x48] sm:$0xff]  ;;  %s2246_s27 = scalar_lea.hbm %s2302_s14, %s1164_s15  ;;  %s1673_s18 = sshll.u32 %s1736_s17, 4  ;;  %s1674_s18 = int_to_ptr.vmem [resolvable:$false] %s1673_s18 }
  0x1e   : > { %1512 = vmatprep.subr.bf16.mxu1 %v1733_v3  ;;  %v1534_v59 = vpack.c.bf16 %v668_v58, %v667_v57  ;;  %v1537_v62 = vpack.c.bf16 %v670_v61, %v669_v60  ;;  %v671_v63 = vld [vmem:[%s2293_s5 + $0x40] sm:$0xff]  ;;  %v673_v2 = vld [vmem:[%s2293_s5 + $0x50] sm:$0xff]  ;;  %v674_v4 = vld [vmem:[%s2293_s5 + $0x58] sm:$0xff] }
  0x1f   : > { %1490 = vmatpush3.bf16.msra.mxu0 %v1489_v21  ;;  %v1540_v1 = vpack.c.bf16 %v672_v0, %v671_v63  ;;  %v1543_v5 = vpack.c.bf16 %v674_v4, %v673_v2  ;;  %v675_v7 = vld [vmem:[%s2293_s5 + $0x60] sm:$0xff]  ;;  %v676_v8 = vld [vmem:[%s2293_s5 + $0x68] sm:$0xff]  ;;  %v677_v15 = vld [vmem:[%s2293_s5 + $0x70] sm:$0xff] }
  0x20   : > { %1491 = vmatprep.subr.bf16.mxu0 %v1733_v3  ;;  %v1546_v9 = vpack.c.bf16 %v676_v8, %v675_v7  ;;  %v1156_v10 = vld [vmem:[%s2290_s2] ss:$0 sm:$0xff]  ;;  %v678_v16 = vld [vmem:[%s2293_s5 + $0x78] sm:$0xff]  ;;  %v757_v19 = vld [vmem:[%s2295_s7 + $0x8] sm:$0xff] }
  0x21   : > { %1514 = vmatpush3.bf16.msra.mxu1 %v1513_v30  ;;  %v1549_v17 = vpack.c.bf16 %v678_v16, %v677_v15  ;;  %v756_v18 = vld [vmem:[%s2295_s7] sm:$0xff]  ;;  %v758_v20 = vld [vmem:[%s2295_s7 + $0x10] sm:$0xff]  ;;  %v759_v22 = vld [vmem:[%s2295_s7 + $0x18] sm:$0xff] }
  0x22   : > { %1515 = vmatprep.subr.bf16.mxu1 %v1733_v3  ;;  %v1552_v21 = vpack.c.bf16 %v757_v19, %v756_v18  ;;  %v1555_v23 = vpack.c.bf16 %v759_v22, %v758_v20  ;;  %v760_v24 = vld [vmem:[%s2295_s7 + $0x20] sm:$0xff]  ;;  %v761_v25 = vld [vmem:[%s2295_s7 + $0x28] sm:$0xff]  ;;  %v763_v28 = vld [vmem:[%s2295_s7 + $0x38] sm:$0xff] }
  0x23   : > { %1493 = vmatpush3.bf16.msra.mxu0 %v1492_v27  ;;  %v1558_v26 = vpack.c.bf16 %v761_v25, %v760_v24  ;;  %v762_v27 = vld [vmem:[%s2295_s7 + $0x30] sm:$0xff]  ;;  %v764_v30 = vld [vmem:[%s2295_s7 + $0x40] sm:$0xff]  ;;  %v765_v31 = vld [vmem:[%s2295_s7 + $0x48] sm:$0xff] }
  0x24   : > { %1494 = vmatprep.subr.bf16.mxu0 %v1733_v3  ;;  %v1561_v29 = vpack.c.bf16 %v763_v28, %v762_v27  ;;  %v1564_v32 = vpack.c.bf16 %v765_v31, %v764_v30  ;;  %v767_v34 = vld [vmem:[%s2295_s7 + $0x58] sm:$0xff]  ;;  %v769_v37 = vld [vmem:[%s2295_s7 + $0x68] sm:$0xff]  ;;  %v770_v44 = vld [vmem:[%s2295_s7 + $0x70] sm:$0xff] }
  0x25   : > { %1517 = vmatpush3.bf16.msra.mxu1 %v1516_v36  ;;  %v768_v36 = vld [vmem:[%s2295_s7 + $0x60] sm:$0xff]  ;;  %v851_v48 = vld [vmem:[%s2297_s9 + $0x8] sm:$0xff]  ;;  %v852_v49 = vld [vmem:[%s2297_s9 + $0x10] sm:$0xff] }
  0x26   : > { %1518 = vmatprep.subr.bf16.mxu1 %v1733_v3  ;;  %v1570_v38 = vpack.c.bf16 %v769_v37, %v768_v36  ;;  %v853_v51 = vld [vmem:[%s2297_s9 + $0x18] sm:$0xff]  ;;  %v854_v53 = vld [vmem:[%s2297_s9 + $0x20] sm:$0xff]  ;;  %v859_v60 = vld [vmem:[%s2297_s9 + $0x48] sm:$0xff] }
  0x27   : > { %1496 = vmatpush3.bf16.msra.mxu0 %v1495_v33  ;;  %v766_v33 = vld [vmem:[%s2295_s7 + $0x50] sm:$0xff]  ;;  %v1579_v52 = vpack.c.bf16 %v853_v51, %v852_v49  ;;  %v857_v57 = vld [vmem:[%s2297_s9 + $0x38] sm:$0xff]  ;;  %v863_v2 = vld [vmem:[%s2297_s9 + $0x68] sm:$0xff] }
  0x28   : > { %1497 = vmatprep.subr.bf16.mxu0 %v1733_v3  ;;  %v1567_v35 = vpack.c.bf16 %v767_v34, %v766_v33  ;;  %v861_v63 = vld [vmem:[%s2297_s9 + $0x58] sm:$0xff]  ;;  %v948_v18 = vld [vmem:[%s2299_s11 + $0x20] sm:$0xff]  ;;  %v949_v19 = vld [vmem:[%s2299_s11 + $0x28] sm:$0xff] }
  0x29   : > { %1520 = vmatpush3.bf16.msra.mxu1 %v1519_v42  ;;  %v947_v16 = vld [vmem:[%s2299_s11 + $0x18] sm:$0xff]  ;;  %v1606_v20 = vpack.c.bf16 %v949_v19, %v948_v18  ;;  %v952_v24 = vld [vmem:[%s2299_s11 + $0x40] sm:$0xff]  ;;  %v953_v25 = vld [vmem:[%s2299_s11 + $0x48] sm:$0xff] }
  0x2a   : > { %1521 = vmatprep.subr.bf16.mxu1 %v1733_v3  ;;  %v951_v22 = vld [vmem:[%s2299_s11 + $0x38] sm:$0xff]  ;;  %v954_v27 = vld [vmem:[%s2299_s11 + $0x50] sm:$0xff]  ;;  %v956_v30 = vld [vmem:[%s2299_s11 + $0x60] sm:$0xff] }
  0x2b   : > { %1499 = vmatpush3.bf16.msra.mxu0 %v1498_v39  ;;  %v1157_v39 = vld [vmem:[%s2292_s4] ss:$0 sm:$0xff]  ;;  %v955_v28 = vld [vmem:[%s2299_s11 + $0x58] sm:$0xff]  ;;  %v957_v31 = vld [vmem:[%s2299_s11 + $0x68] sm:$0xff] }
  0x2c   : > { %1500 = vmatprep.subr.bf16.mxu0 %v1733_v3  ;;  %v1159_v33 = vld [vmem:[%s2296_s8] ss:$0 sm:$0xff] }
  0x2d   : > { %1523 = vmatpush3.bf16.msra.mxu1 %v1522_v46 }
  0x2e   : > { %1524 = vmatprep.subr.bf16.mxu1 %v1733_v3 }
  0x2f   : > { %1502 = vmatpush3.bf16.msra.mxu0 %v1501_v45  ;;  %v771_v45 = vld [vmem:[%s2295_s7 + $0x78] sm:$0xff] }
  0x30   : > { %1527 = vmatprep.subr.bf16.mxu0 %v1733_v3  ;;  %v1573_v46 = vpack.c.bf16 %v771_v45, %v770_v44  ;;  %v1161_v45 = vld [vmem:[%s2300_s12] ss:$0 sm:$0xff] }
  0x31   : > { %1526 = vmatpush3.bf16.msra.mxu1 %v1525_v50 }
  0x32   : > { %1302 = vmatmul.mubr.f32.vlgmr.msra.gmra.mrb[0].mxu0 %v474_v47  ;;  %1551 = vmatprep.subr.bf16.mxu1 %v1733_v3  ;;  %v850_v47 = vld [vmem:[%s2297_s9] sm:$0xff] }
  0x33   : > { %1371 = vmatprep.mubr.msk.f32.mxu0 %vm1734_vm0, %v1735_v6  ;;  %1529 = vmatpush3.bf16.msra.mxu0 %v1528_v54  ;;  %v1576_v50 = vpack.c.bf16 %v851_v48, %v850_v47  ;;  %v855_v54 = vld [vmem:[%s2297_s9 + $0x28] sm:$0xff] }
  0x34   : > { %1530 = vmatprep.subr.bf16.mxu0 %v1733_v3  ;;  %v1582_v55 = vpack.c.bf16 %v855_v54, %v854_v53 }
  0x37   : > { %1532 = vmatpush3.bf16.msra.mxu0 %v1531_v56  ;;  %v856_v56 = vld [vmem:[%s2297_s9 + $0x30] sm:$0xff] }
  0x38   : > { %1533 = vmatprep.subr.bf16.mxu0 %v1733_v3  ;;  %v1585_v58 = vpack.c.bf16 %v857_v57, %v856_v56 }
  0x3b   : > { %1535 = vmatpush3.bf16.msra.mxu0 %v1534_v59  ;;  %v858_v59 = vld [vmem:[%s2297_s9 + $0x40] sm:$0xff] }
  0x3c   : > { %1536 = vmatprep.subr.bf16.mxu0 %v1733_v3  ;;  %v1588_v61 = vpack.c.bf16 %v859_v60, %v858_v59 }
  0x3f   : > { %1538 = vmatpush3.bf16.msra.mxu0 %v1537_v62  ;;  %v860_v62 = vld [vmem:[%s2297_s9 + $0x50] sm:$0xff] }
  0x40   : > { %1539 = vmatprep.subr.bf16.mxu0 %v1733_v3  ;;  %v1591_v0 = vpack.c.bf16 %v861_v63, %v860_v62 }
  0x43   : > { %1541 = vmatpush3.bf16.msra.mxu0 %v1540_v1  ;;  %v862_v1 = vld [vmem:[%s2297_s9 + $0x60] sm:$0xff] }
  0x44   : > { %1542 = vmatprep.subr.bf16.mxu0 %v1733_v3  ;;  %v1594_v4 = vpack.c.bf16 %v863_v2, %v862_v1 }
  0x47   : > { %1544 = vmatpush3.bf16.msra.mxu0 %v1543_v5  ;;  %v1158_v5 = vld [vmem:[%s2294_s6] ss:$0 sm:$0xff] }
  0x48   : > { %1545 = vmatprep.subr.bf16.mxu0 %v1733_v3 }
  0x4b   : > { %1547 = vmatpush3.bf16.msra.mxu0 %v1546_v9 }
  0x4c   : > { %1548 = vmatprep.subr.bf16.mxu0 %v1733_v3 }
  0x4f   : > { %1550 = vmatpush3.bf16.msra.mxu0 %v1549_v17 }
  0x50   : > { %1575 = vmatprep.subr.bf16.mxu0 %v1733_v3 }
 0x105   : > { %v564_v11 = vpop.f32.mrb[0].mxu0 }
 0x106   : > { %v565_v12 = vadd.f32 %v1156_v10, %v564_v11  ;;  %v1303_v13 = vpop.f32.mrb[1].mxu0  ;;  %v864_v10 = vld [vmem:[%s2297_s9 + $0x70] sm:$0xff]  ;;  %v865_v11 = vld [vmem:[%s2297_s9 + $0x78] sm:$0xff] }
 0x107   : > { %v944_v13 = vld [vmem:[%s2299_s11] sm:$0xff] }
 0x108   : > { %v568_v14 = vmax.f32 %v565_v12, 0.0  ;;  %v1597_v12 = vpack.c.bf16 %v865_v11, %v864_v10 }
 0x10a   : > { %1337 = vmatmul.mubr.f32.vlgmr.msra.gmra.mrb[0].mxu1 %v568_v14  ;;  %v945_v14 = vld [vmem:[%s2299_s11 + $0x8] sm:$0xff] }
 0x10b   : > { %1406 = vmatprep.mubr.msk.f32.mxu1 %vm1734_vm0, %v1735_v6  ;;  %1553 = vmatpush3.bf16.msra.mxu1 %v1552_v21  ;;  %v1600_v15 = vpack.c.bf16 %v945_v14, %v944_v13  ;;  %v950_v21 = vld [vmem:[%s2299_s11 + $0x30] sm:$0xff] }
 0x10c   : > { %1554 = vmatprep.subr.bf16.mxu1 %v1733_v3 }
 0x10f   : > { %1556 = vmatpush3.bf16.msra.mxu1 %v1555_v23  ;;  %v1609_v23 = vpack.c.bf16 %v951_v22, %v950_v21 }
 0x110   : > { %1557 = vmatprep.subr.bf16.mxu1 %v1733_v3 }
 0x113   : > { %1559 = vmatpush3.bf16.msra.mxu1 %v1558_v26  ;;  %v1612_v26 = vpack.c.bf16 %v953_v25, %v952_v24 }
 0x114   : > { %1560 = vmatprep.subr.bf16.mxu1 %v1733_v3 }
 0x117   : > { %1562 = vmatpush3.bf16.msra.mxu1 %v1561_v29  ;;  %v1615_v29 = vpack.c.bf16 %v955_v28, %v954_v27 }
 0x118   : > { %1563 = vmatprep.subr.bf16.mxu1 %v1733_v3 }
 0x11b   : > { %1565 = vmatpush3.bf16.msra.mxu1 %v1564_v32  ;;  %v1618_v32 = vpack.c.bf16 %v957_v31, %v956_v30 }
 0x11c   : > { %1566 = vmatprep.subr.bf16.mxu1 %v1733_v3 }
 0x11f   : > { %1568 = vmatpush3.bf16.msra.mxu1 %v1567_v35 }
 0x120   : > { %1569 = vmatprep.subr.bf16.mxu1 %v1733_v3 }
 0x123   : > { %1571 = vmatpush3.bf16.msra.mxu1 %v1570_v38  ;;  %v958_v38 = vld [vmem:[%s2299_s11 + $0x70] sm:$0xff] }
 0x124   : > { %1572 = vmatprep.subr.bf16.mxu1 %v1733_v3 }
 0x127   : > { %1574 = vmatpush3.bf16.msra.mxu1 %v1573_v46 }
 0x128   : > { %1599 = vmatprep.subr.bf16.mxu1 %v1733_v3 }
 0x1dd   : > { %v658_v40 = vpop.f32.mrb[0].mxu1 }
 0x1de   : > { %v659_v41 = vadd.f32 %v1157_v39, %v658_v40  ;;  %v1338_v42 = vpop.f32.mrb[1].mxu1  ;;  %v959_v39 = vld [vmem:[%s2299_s11 + $0x78] sm:$0xff] }
 0x1df   : > { %v1621_v40 = vpack.c.bf16 %v959_v39, %v958_v38 }
 0x1e0   : > { %v662_v43 = vmax.f32 %v659_v41, 0.0 }
 0x1e2   : > { %1372 = vmatmul.mubr.f32.vlgmr.msra.gmra.mrb[2].mxu0 %v662_v43 }
 0x1e3   : > { %1441 = vmatprep.mubr.msk.f32.mxu0 %vm1734_vm0, %v1735_v6  ;;  %1577 = vmatpush3.bf16.msra.mxu0 %v1576_v50 }
 0x1e4   : > { %1578 = vmatprep.subr.bf16.mxu0 %v1733_v3 }
 0x1e7   : > { %1580 = vmatpush3.bf16.msra.mxu0 %v1579_v52 }
 0x1e8   : > { %1581 = vmatprep.subr.bf16.mxu0 %v1733_v3 }
 0x1eb   : > { %1583 = vmatpush3.bf16.msra.mxu0 %v1582_v55 }
 0x1ec   : > { %1584 = vmatprep.subr.bf16.mxu0 %v1733_v3 }
 0x1ef   : > { %1586 = vmatpush3.bf16.msra.mxu0 %v1585_v58 }
 0x1f0   : > { %1587 = vmatprep.subr.bf16.mxu0 %v1733_v3 }
 0x1f3   : > { %1589 = vmatpush3.bf16.msra.mxu0 %v1588_v61 }
 0x1f4   : > { %1590 = vmatprep.subr.bf16.mxu0 %v1733_v3 }
 0x1f7   : > { %1592 = vmatpush3.bf16.msra.mxu0 %v1591_v0 }
 0x1f8   : > { %1593 = vmatprep.subr.bf16.mxu0 %v1733_v3 }
 0x1fb   : > { %1595 = vmatpush3.bf16.msra.mxu0 %v1594_v4 }
 0x1fc   : > { %1596 = vmatprep.subr.bf16.mxu0 %v1733_v3 }
 0x1ff   : > { %1598 = vmatpush3.bf16.msra.mxu0 %v1597_v12 }
 0x2b5   : > { %v752_v7 = vpop.f32.mrb[2].mxu0 }
 0x2b6   : > { %v753_v8 = vadd.f32 %v1158_v5, %v752_v7  ;;  %v1373_v9 = vpop.f32.mrb[3].mxu0 }
 0x2b8   : > { %1043 = vst [vmem:[%s473_s21] sm:$0xff] %v753_v8  ;;  %1407 = vmatmul.mubr.f32.vlgmr.msra.gmra.mrb[2].mxu1 %v753_v8  ;;  %s1153_s21 = sshll.u32 %s463_s20, 3 }
 0x2b9   : > { %1476 = vmatprep.mubr.msk.f32.mxu1 %vm1734_vm0, %v1735_v6  ;;  %v946_v6 = vld [vmem:[%s2299_s11 + $0x10] sm:$0xff]  ;;  %1601 = vmatpush3.bf16.msra.mxu1 %v1600_v15  ;;  %s465_s25 = scalar_lea.vmem [#allocation2], %s1153_s21  ;;  %s1675_s21 = scalar_lea.vmem %s1674_s18, 256 }
 0x2ba   : > { %v1603_v17 = vpack.c.bf16 %v947_v16, %v946_v6  ;;  %1602 = vmatprep.subr.bf16.mxu1 %v1733_v3  ;;  %s1066_s26 = sshll.u32 %s465_s25, 4  ;;  %s2248_s26 = int_to_ptr.vmem [resolvable:$true] %s1066_s26 }
 0x2bb   : > { %s1669_s19 = scalar_lea.vmem %s2248_s26, 128  ;;  %p1676_p0 = scmp.lt.s32.totalorder %s2248_s26, %s1674_s18 }
 0x2bc   : > { %p1670_p11 = scmp.ne.s32.totalorder %s2248_s26, %s1669_s19  ;;  %p1677_p1 = scmp.lt.s32.totalorder %s1675_s21, %s1669_s19 }
 0x2bd   : > { %1604 = vmatpush3.bf16.msra.mxu1 %v1603_v17 }
 0x2be   : > { %1605 = vmatprep.subr.bf16.mxu1 %v1733_v3  ;;  %p1671_p12 = pnand %p1670_p11, %p1850_p5  ;;  %p1678_p2 = por %p1677_p1, %p1676_p0 }
 0x2c0   : > { %p1672_p13 = pneg %p1671_p12 }
 0x2c1   : > { %1607 = vmatpush3.bf16.msra.mxu1 %v1606_v20 }
 0x2c2   : > { %1608 = vmatprep.subr.bf16.mxu1 %v1733_v3  ;;  %p1679_p3 = pnand %p1678_p2, %p1672_p13 }
 0x2c5   : > { %1610 = vmatpush3.bf16.msra.mxu1 %v1609_v23 }
 0x2c6   : > { %1611 = vmatprep.subr.bf16.mxu1 %v1733_v3 }
 0x2c9   : > { %1613 = vmatpush3.bf16.msra.mxu1 %v1612_v26 }
 0x2ca   : > { %1614 = vmatprep.subr.bf16.mxu1 %v1733_v3 }
 0x2cd   : > { %1616 = vmatpush3.bf16.msra.mxu1 %v1615_v29 }
 0x2ce   : > { %1617 = vmatprep.subr.bf16.mxu1 %v1733_v3 }
 0x2d1   : > { %1619 = vmatpush3.bf16.msra.mxu1 %v1618_v32 }
 0x2d2   : > { %1620 = vmatprep.subr.bf16.mxu1 %v1733_v3  ;;  %v1160_v3 = vld [vmem:[%s2298_s10] ss:$0 sm:$0xff] }
 0x2d5   : > { %1622 = vmatpush3.bf16.msra.mxu1 %v1621_v40 }
 0x38b   : > { %v845_v34 = vpop.f32.mrb[2].mxu1 }
 0x38c   : > { %v846_v35 = vadd.f32 %v1159_v33, %v845_v34  ;;  %v1408_v36 = vpop.f32.mrb[3].mxu1 }
 0x38e   : > { %v849_v37 = vmax.f32 %v846_v35, 0.0 }
 0x390   : > { %1442 = vmatmul.mubr.f32.vlgmr.msra.gmra.mrb[4].mxu0 %v849_v37 }
 0x463   : > { %v939_v41 = vpop.f32.mrb[4].mxu0 }
 0x464   : > { %v940_v42 = vadd.f32 %v1160_v3, %v939_v41  ;;  %v1443_v43 = vpop.f32.mrb[5].mxu0 }
 0x466   : > { %v943_v44 = vmax.f32 %v940_v42, 0.0 }
 0x468   : > { %1477 = vmatmul.mubr.f32.vlgmr.msra.gmra.mrb[4].mxu1 %v943_v44 }
 0x53b   : > { %v1033_v46 = vpop.f32.mrb[4].mxu1 }
 0x53c   : > { %v1034_v47 = vadd.f32 %v1161_v45, %v1033_v46  ;;  %v1478_v48 = vpop.f32.mrb[5].mxu1 }
 0x53e   : > { %v1162_v49 = vmul.f32 -1.442695, %v1034_v47 }
 0x540   : > { %1665 = vpow2.f32 %v1162_v49 }
 0x54a   : > { %v1666_v50 = vpop.eup %1665 }
 0x54b   : > { %v1040_v51 = vadd.f32 1.0, %v1666_v50 }
 0x54d   : > { %1667 = vrcp.f32 %v1040_v51 }
 0x557   : > { %v1668_v52 = vpop.eup %1667 }
 0x558   : > { %1044 = vst [vmem:[%s465_s25] sm:$0xff] %v1668_v52 }
 0x559   : > { %1682 = shalt.err (!%p1679_p3)
}
 0x55a   : > { %s1683_s20 = scalar_lea.hbm %s2246_s27, 128  ;;  %s1687_s22 = scalar_lea.hbm %s2302_s14, 256 }
 0x55b   : > { %p1684_p4 = scmp.ne.s32.totalorder %s2246_s27, %s1683_s20  ;;  %p1688_p9 = scmp.lt.u32.totalorder %s2246_s27, %s2302_s14 }
 0x55c   : > { %p1689_p10 = scmp.lt.u32.totalorder %s1687_s22, %s1683_s20  ;;  %p1691_p12 = scmp.lt.u32.totalorder %s1683_s20, %s2246_s27 }
 0x55d   : > { %p1685_p7 = pnand %p1684_p4, %p1850_p5 }
 0x55e   : > { %p1690_p11 = por %p1689_p10, %p1688_p9 }
 0x55f   : > { %p1686_p8 = pneg %p1685_p7 }
 0x560   : > { %p1692_p13 = por %p1691_p12, %p1690_p11 }
 0x562   : > { %p1693_p0 = pnand %p1692_p13, %p1686_p8 }
 0x564   : > { %1696 = shalt.err (!%p1693_p0)
}
 0x565   : > { %1623 = dma.vmem_to_hbm [thread:$0]  (%p1850_p5), %s2248_s26, 128, %s2246_s27, %s1050_s28  }
 0x566 PF: > { %p1629_p1 = scmp.ge.s32.totalorder %s1731_s16, 2  ;;  %s1085_s18 = sand.u32 1, %s1719_s29  }
 0x567   : > { %s1086_s21 = scalar_lea.sflag [#allocation3], %s1085_s18 }
 0x568   : > { %p1626_p2 = pnand %p1629_p1, %p1854_p6 }
 0x56a   : > { %1714 = dma.done.wait (!%p1626_p2), %s1086_s21, 128  }
 0x56b   : > { %1716 = vsyncadd (!%p1626_p2), %s1086_s21, 4294967168  ;;  %s2316_s16 = sld [smem:[#allocation6_spill]]  ;;  %s2317_s20 = sld [smem:[#allocation5_spill]] }
 0x56c   : > { %s2318_s15 = sld [smem:[#allocation7_spill]]  ;;  %s2319_s29 = smov %s1723_s30 }
 0x571   : > { %p25_p3 = scmp.ge.s32.totalorder %s2316_s16, 4   ;;  %s2320_s30 = smov %s2317_s20 }
 0x573   :  { %27 = sbr.rel (!%p25_p3) target bundleno = 3 (0x3), region = 119 }
 0x57a   :  { %1091 = vsyncpa [#allocation3], 1 }
 0x57b   :  { %1093 = vsyncpa [#allocation3 + $0x1], 1 }

</bundles_post_ra>
